<compile_context>
chip_gen: v7x
topology: tpu7x:2x2x1
jax: 0.10.0
libtpu: 0.0.40
codegen_flags: <defaults>
</compile_context>

<pallas_src>
import functools

import jax
import jax.numpy as jnp
from jax.experimental import pallas as pl
from jax.experimental.pallas import tpu as pltpu

BN_EPS = 1e-5


def _round_up(x, m):
    return (x + m - 1) // m * m


# ---------------------------------------------------------------------------
# Fused single-call kernel: conv output stays resident in VMEM scratch.
# ---------------------------------------------------------------------------
def _fused_conv_bn_silu_kernel(p_ref, w_ref, gamma_ref, beta_ref, o_ref,
                               y_all_ref, stats_ref, ss_ref, *, inv_m):
    j = pl.program_id(0)   # phase: 0 = conv + batch stats, 1 = BN + SiLU
    i = pl.program_id(1)   # row (M) tile

    @pl.when(j == 0)
    def _phase0():
        @pl.when(i == 0)
        def _():
            stats_ref[...] = jnp.zeros_like(stats_ref)

        # MXU matmul, f32 accumulate; keep the tile resident in VMEM.
        y = jnp.dot(p_ref[...], w_ref[...], preferred_element_type=jnp.float32)
        y_all_ref[i] = y

        # Per-channel reductions run on the XLU while the MXU works on the
        # next tile, so the BN statistics come nearly for free.
        stats_ref[0:1, :] = stats_ref[0:1, :] + jnp.sum(y, axis=0, keepdims=True)
        stats_ref[1:2, :] = stats_ref[1:2, :] + jnp.sum(y * y, axis=0,
                                                        keepdims=True)

        # Fold batch mean/var + gamma/beta into one scale/shift pair.
        @pl.when(i == pl.num_programs(1) - 1)
        def _():
            mean = stats_ref[0:1, :] * inv_m
            ex2 = stats_ref[1:2, :] * inv_m
            var = jnp.maximum(ex2 - mean * mean, 0.0)   # biased (training) var
            inv_std = jax.lax.rsqrt(var + BN_EPS)
            scale = gamma_ref[...] * inv_std
            ss_ref[0:1, :] = scale
            ss_ref[1:2, :] = beta_ref[...] - mean * scale

    @pl.when(j == 1)
    def _phase1():
        y = y_all_ref[i]                               # VMEM-resident, no HBM
        yn = y * ss_ref[0:1, :] + ss_ref[1:2, :]
        o_ref[...] = yn * jax.nn.sigmoid(yn)


# ---------------------------------------------------------------------------
# Two-pass fallback (conv output too large to keep resident in VMEM).
# ---------------------------------------------------------------------------
def _conv_stats_kernel(p_ref, w_ref, y_ref, stats_ref):
    y = jnp.dot(p_ref[...], w_ref[...], preferred_element_type=jnp.float32)
    y_ref[...] = y

    @pl.when(pl.program_id(0) == 0)
    def _():
        stats_ref[...] = jnp.zeros_like(stats_ref)

    stats_ref[0:1, :] = stats_ref[0:1, :] + jnp.sum(y, axis=0, keepdims=True)
    stats_ref[1:2, :] = stats_ref[1:2, :] + jnp.sum(y * y, axis=0, keepdims=True)


def _bn_silu_kernel(y_ref, scale_ref, shift_ref, o_ref):
    yn = y_ref[...] * scale_ref[...] + shift_ref[...]
    o_ref[...] = yn * jax.nn.sigmoid(yn)


def _two_pass_path(patches_p, w_p, gamma_p, beta_p, *, M, TM, Kp, Cp,
                   n_tiles, cdt):
    Mp = n_tiles * TM
    vmem_limit = int(min(
        64 * 1024 * 1024,
        max(16 * 1024 * 1024,
            2 * (2 * TM * Kp * cdt.itemsize + 2 * TM * Cp * 4
                 + Kp * Cp * cdt.itemsize + 4 * Cp * 4) + (2 << 20))))

    y_flat, stats = pl.pallas_call(
        _conv_stats_kernel,
        out_shape=(jax.ShapeDtypeStruct((Mp, Cp), jnp.float32),
                   jax.ShapeDtypeStruct((2, Cp), jnp.float32)),
        grid=(n_tiles,),
        in_specs=[
            pl.BlockSpec((TM, Kp), lambda i: (i, 0)),
            pl.BlockSpec((Kp, Cp), lambda i: (0, 0)),   # resident weight
        ],
        out_specs=(
            pl.BlockSpec((TM, Cp), lambda i: (i, 0)),
            pl.BlockSpec((2, Cp), lambda i: (0, 0)),    # resident accumulator
        ),
        compiler_params=pltpu.CompilerParams(
            dimension_semantics=("arbitrary",),
            vmem_limit_bytes=vmem_limit),
    )(patches_p, w_p)

    mean = stats[0:1, :] * (1.0 / M)
    ex2 = stats[1:2, :] * (1.0 / M)
    var = jnp.maximum(ex2 - mean * mean, 0.0)
    inv_std = jax.lax.rsqrt(var + BN_EPS)
    scale = gamma_p * inv_std
    shift = beta_p - mean * scale

    return pl.pallas_call(
        _bn_silu_kernel,
        out_shape=jax.ShapeDtypeStruct((Mp, Cp), jnp.float32),
        grid=(n_tiles,),
        in_specs=[
            pl.BlockSpec((TM, Cp), lambda i: (i, 0)),
            pl.BlockSpec((1, Cp), lambda i: (0, 0)),
            pl.BlockSpec((1, Cp), lambda i: (0, 0)),
        ],
        out_specs=pl.BlockSpec((TM, Cp), lambda i: (i, 0)),
        compiler_params=pltpu.CompilerParams(
            dimension_semantics=("parallel",),
            vmem_limit_bytes=vmem_limit),
    )(y_flat, scale, shift)


# ---------------------------------------------------------------------------
# Wrapper
# ---------------------------------------------------------------------------
def conv_forward(x_nchw, w_oihw, gamma, beta, *, k=3, s=1, p=None,
                 tile_m=512, compute_dtype=jnp.bfloat16,
                 fused_vmem_budget=48 * 1024 * 1024):
    """Conv.forward(x): Conv2d(bias=False) -> BatchNorm2d (batch statistics,
    biased variance, i.e. fresh BN in training mode) -> SiLU."""
    if p is None:
        p = k // 2  # autopad, dilation=1
    N, C1, H, W = x_nchw.shape
    C2 = w_oihw.shape[0]
    Ho = (H + 2 * p - k) // s + 1
    Wo = (W + 2 * p - k) // s + 1

    # --- glue: NCHW -> NHWC, pad, im2col (see TODO at top) ---
    x_nhwc = jnp.transpose(x_nchw, (0, 2, 3, 1))
    x_pad = jnp.pad(x_nhwc, ((0, 0), (p, p), (p, p), (0, 0)))
    taps = [x_pad[:, kh:kh + s * Ho:s, kw:kw + s * Wo:s, :]
            for kh in range(k) for kw in range(k)]
    # [N, Ho, Wo, K*K, C1] -> [M, K*K*C1]  (column = (kh*k+kw)*C1 + c)
    patches = jnp.stack(taps, axis=3).reshape(N * Ho * Wo, k * k * C1)
    # [Cout, Cin, kh, kw] -> [K*K*Cin, Cout]
    w_mat = jnp.transpose(w_oihw, (2, 3, 1, 0)).reshape(k * k * C1, C2)

    M, Kdim = patches.shape

    # --- pad to lane/MXU-friendly shapes ---
    Kp = _round_up(Kdim, 128)          # contraction dim, lane-dense
    Cp = _round_up(C2, 128)            # output channels, lane-dense stores
    TM = min(tile_m, _round_up(M, 8))  # row tile (sublane multiple of 8)
    Mp = _round_up(M, TM)
    n_tiles = Mp // TM

    cdt = jnp.dtype(compute_dtype)
    patches_p = jnp.zeros((Mp, Kp), cdt).at[:M, :Kdim].set(patches.astype(cdt))
    w_p = jnp.zeros((Kp, Cp), cdt).at[:Kdim, :C2].set(w_mat.astype(cdt))
    gamma_p = jnp.zeros((1, Cp), jnp.float32).at[0, :C2].set(
        gamma.astype(jnp.float32))
    beta_p = jnp.zeros((1, Cp), jnp.float32).at[0, :C2].set(
        beta.astype(jnp.float32))

    # VMEM footprint of the fused path (conv output held resident).
    fused_bytes = (Mp * Cp * 4                      # resident conv output
                   + 2 * TM * Kp * cdt.itemsize     # patch double buffer
                   + Kp * Cp * cdt.itemsize         # resident weight
                   + 2 * TM * Cp * 4                # output double buffer
                   + 8 * Cp * 4)                    # stats/scale/shift/gamma/beta

    if fused_bytes <= fused_vmem_budget:
        vmem_limit = int(min(64 * 1024 * 1024,
                             max(16 * 1024 * 1024, fused_bytes + (2 << 20))))
        out_flat = pl.pallas_call(
            functools.partial(_fused_conv_bn_silu_kernel, inv_m=1.0 / M),
            out_shape=jax.ShapeDtypeStruct((Mp, Cp), jnp.float32),
            grid=(2, n_tiles),
            in_specs=[
                # patches: walk the M tiles in phase 0, pin to block 0 in
                # phase 1 so no extra HBM fetches are issued.
                pl.BlockSpec((TM, Kp), lambda j, i: (i * (1 - j), 0)),
                pl.BlockSpec((Kp, Cp), lambda j, i: (0, 0)),   # resident weight
                pl.BlockSpec((1, Cp), lambda j, i: (0, 0)),    # resident gamma
                pl.BlockSpec((1, Cp), lambda j, i: (0, 0)),    # resident beta
            ],
            # output stays pinned at block 0 during phase 0 (never touched),
            # then each block is written exactly once in phase 1.
            out_specs=pl.BlockSpec((TM, Cp), lambda j, i: (i * j, 0)),
            scratch_shapes=[
                pltpu.VMEM((n_tiles, TM, Cp), jnp.float32),  # resident conv out
                pltpu.VMEM((2, Cp), jnp.float32),            # sum / sumsq
                pltpu.VMEM((2, Cp), jnp.float32),            # scale / shift
            ],
            compiler_params=pltpu.CompilerParams(
                dimension_semantics=("arbitrary", "arbitrary"),
                vmem_limit_bytes=vmem_limit),
        )(patches_p, w_p, gamma_p, beta_p)
    else:
        out_flat = _two_pass_path(patches_p, w_p, gamma_p, beta_p,
                                  M=M, TM=TM, Kp=Kp, Cp=Cp,
                                  n_tiles=n_tiles, cdt=cdt)

    # strip padding, [M, Cout] -> NHWC -> NCHW
    out = out_flat[:M, :C2].reshape(N, Ho, Wo, C2)
    return jnp.transpose(out, (0, 3, 1, 2))


def _reference(x_nchw, w_oihw, gamma, beta, *, s=1, p=1,
               compute_dtype=jnp.bfloat16):
    """Pure-JAX reference; inputs rounded through compute_dtype to model the
    same bf16-input / f32-accumulate MXU matmul."""
    xr = x_nchw.astype(compute_dtype).astype(jnp.float32)
    wr = w_oihw.astype(compute_dtype).astype(jnp.float32)
    y = jax.lax.conv_general_dilated(
        xr, wr, window_strides=(s, s), padding=[(p, p), (p, p)],
        dimension_numbers=("NCHW", "OIHW", "NCHW"))
    mean = jnp.mean(y, axis=(0, 2, 3), keepdims=True)
    var = jnp.mean((y - mean) ** 2, axis=(0, 2, 3), keepdims=True)
    yn = (y - mean) * jax.lax.rsqrt(var + BN_EPS)
    yn = yn * gamma.reshape(1, -1, 1, 1) + beta.reshape(1, -1, 1, 1)
    return yn * jax.nn.sigmoid(yn)


if __name__ == "__main__":
    # Conv(c1=4, c2=8, k=3, s=1) on x of shape [2, 4, 16, 16]
    c1, c2, k, s = 4, 8, 3, 1
    key = jax.random.PRNGKey(0)
    kx, kw, kg, kb = jax.random.split(key, 4)

    x = jax.random.normal(kx, (2, c1, 16, 16), dtype=jnp.float32)
    fan_in = c1 * k * k
    w = jax.random.normal(kw, (c2, c1, k, k), dtype=jnp.float32) * (2.0 / fan_in) ** 0.5
    gamma = 1.0 + 0.1 * jax.random.normal(kg, (c2,), dtype=jnp.float32)
    beta = 0.1 * jax.random.normal(kb, (c2,), dtype=jnp.float32)

    # tile_m=128 -> 4 row tiles, so the cross-tile BN-stat accumulation and
    # the two-phase structure are actually exercised at this toy size.
    fwd = jax.jit(functools.partial(conv_forward, k=k, s=s, tile_m=128))
    out = jax.block_until_ready(fwd(x, w, gamma, beta))

    ref = _reference(x, w, gamma, beta, s=s, p=k // 2)
    assert out.shape == (2, c2, 16, 16), out.shape
    max_err = float(jnp.max(jnp.abs(out - ref)))
    assert jnp.allclose(out, ref, atol=2e-3, rtol=2e-3), f"mismatch vs reference: {max_err}"

    print("KERNEL_OK")
</pallas_src>

<mosaic_0001>
module attributes {stable_mosaic.version = 11 : i64} {
  func.func @_fused_conv_bn_silu_kernel(%arg0: i32, %arg1: i32, %arg2: memref<128x128xbf16, #tpu.memory_space<vmem>>, %arg3: memref<128x128xbf16, #tpu.memory_space<vmem>>, %arg4: memref<1x128xf32, #tpu.memory_space<vmem>>, %arg5: memref<1x128xf32, #tpu.memory_space<vmem>>, %arg6: memref<128x128xf32, #tpu.memory_space<vmem>>, %arg7: memref<4x128x128xf32, #tpu.memory_space<vmem>>, %arg8: memref<2x128xf32, #tpu.memory_space<vmem>>, %arg9: memref<2x128xf32, #tpu.memory_space<vmem>>) attributes {dimension_semantics = [#tpu.dimension_semantics<arbitrary>, #tpu.dimension_semantics<arbitrary>], iteration_bounds = array<i64: 2, 4>, scalar_prefetch = 0 : i64, scratch_operands = 3 : i64, tpu.core_type = #tpu.core_type<tc>, window_params = [{transform_indices = @transform_0, window_bounds = array<i64: 128, 128>}, {pipeline_mode = #tpu.pipeline_mode<synchronous>, transform_indices = @transform_1, window_bounds = array<i64: 128, 128>}, {pipeline_mode = #tpu.pipeline_mode<synchronous>, transform_indices = @transform_2, window_bounds = array<i64: 1, 128>}, {pipeline_mode = #tpu.pipeline_mode<synchronous>, transform_indices = @transform_3, window_bounds = array<i64: 1, 128>}, {transform_indices = @transform_4, window_bounds = array<i64: 128, 128>}]} {
    %c0_i32 = arith.constant 0 : i32
    %0 = arith.cmpi eq, %arg0, %c0_i32 : i32
    %1 = arith.extui %0 : i1 to i32
    %c0_i32_0 = arith.constant 0 : i32
    %2 = arith.cmpi ne, %1, %c0_i32_0 : i32
    scf.if %2 {
      %c0_i32_2 = arith.constant 0 : i32
      %6 = arith.cmpi eq, %arg1, %c0_i32_2 : i32
      %7 = arith.extui %6 : i1 to i32
      %c0_i32_3 = arith.constant 0 : i32
      %8 = arith.cmpi ne, %7, %c0_i32_3 : i32
      scf.if %8 {
        %cst_19 = arith.constant 0.000000e+00 : f32
        %30 = vector.broadcast %cst_19 : f32 to vector<2x128xf32>
        %c0_20 = arith.constant 0 : index
        %c0_21 = arith.constant 0 : index
        %31 = vector.load %arg8[%c0_20, %c0_21] : memref<2x128xf32, #tpu.memory_space<vmem>>, vector<2x128xf32>
        tpu.vector_store %arg8[%c0_20, %c0_21], %30 {strides = array<i32>} : memref<2x128xf32, #tpu.memory_space<vmem>>, vector<2x128xf32>,
      } else {
      }
      %c0 = arith.constant 0 : index
      %c0_4 = arith.constant 0 : index
      %9 = vector.load %arg2[%c0, %c0_4] : memref<128x128xbf16, #tpu.memory_space<vmem>>, vector<128x128xbf16>
      %c0_5 = arith.constant 0 : index
      %c0_6 = arith.constant 0 : index
      %10 = vector.load %arg3[%c0_5, %c0_6] : memref<128x128xbf16, #tpu.memory_space<vmem>>, vector<128x128xbf16>
      %cst = arith.constant dense<0.000000e+00> : vector<128x128xf32>
      %11 = tpu.matmul %9, %10, %cst {dimension_numbers = #tpu.dot_dimension_numbers<[1], [0], [0], [1], [0, 0, 1, 1], [], []>} : vector<128x128xbf16>, vector<128x128xbf16>, vector<128x128xf32> -> vector<128x128xf32>
      %12 = arith.index_cast %arg1 : i32 to index
      %c0_7 = arith.constant 0 : index
      %c0_8 = arith.constant 0 : index
      %13 = vector.load %arg7[%12, %c0_7, %c0_8] : memref<4x128x128xf32, #tpu.memory_space<vmem>>, vector<1x128x128xf32>
      %14 = vector.shape_cast %13 : vector<1x128x128xf32> to vector<128x128xf32>
      %15 = vector.shape_cast %11 : vector<128x128xf32> to vector<1x128x128xf32>
      tpu.vector_store %arg7[%12, %c0_7, %c0_8], %15 {strides = array<i32>} : memref<4x128x128xf32, #tpu.memory_space<vmem>>, vector<1x128x128xf32>,
      %c0_9 = arith.constant 0 : index
      %c0_10 = arith.constant 0 : index
      %16 = vector.load %arg8[%c0_9, %c0_10] : memref<2x128xf32, #tpu.memory_space<vmem>>, vector<1x128xf32>
      %cst_11 = arith.constant dense<0.000000e+00> : vector<128xf32>
      %17 = vector.multi_reduction <add>, %11, %cst_11 [0] : vector<128x128xf32> to vector<128xf32>
      %18 = vector.shape_cast %17 : vector<128xf32> to vector<1x128xf32>
      %19 = arith.addf %16, %18 : vector<1x128xf32>
      %c0_12 = arith.constant 0 : index
      %c0_13 = arith.constant 0 : index
      %20 = vector.load %arg8[%c0_12, %c0_13] : memref<2x128xf32, #tpu.memory_space<vmem>>, vector<1x128xf32>
      tpu.vector_store %arg8[%c0_12, %c0_13], %19 {strides = array<i32>} : memref<2x128xf32, #tpu.memory_space<vmem>>, vector<1x128xf32>,
      %c1 = arith.constant 1 : index
      %c0_14 = arith.constant 0 : index
      %21 = vector.load %arg8[%c1, %c0_14] : memref<2x128xf32, #tpu.memory_space<vmem>>, vector<1x128xf32>
      %22 = arith.mulf %11, %11 : vector<128x128xf32>
      %cst_15 = arith.constant dense<0.000000e+00> : vector<128xf32>
      %23 = vector.multi_reduction <add>, %22, %cst_15 [0] : vector<128x128xf32> to vector<128xf32>
      %24 = vector.shape_cast %23 : vector<128xf32> to vector<1x128xf32>
      %25 = arith.addf %21, %24 : vector<1x128xf32>
      %c1_16 = arith.constant 1 : index
      %c0_17 = arith.constant 0 : index
      %26 = vector.load %arg8[%c1_16, %c0_17] : memref<2x128xf32, #tpu.memory_space<vmem>>, vector<1x128xf32>
      tpu.vector_store %arg8[%c1_16, %c0_17], %25 {strides = array<i32>} : memref<2x128xf32, #tpu.memory_space<vmem>>, vector<1x128xf32>,
      %c3_i32 = arith.constant 3 : i32
      %27 = arith.cmpi eq, %arg1, %c3_i32 : i32
      %28 = arith.extui %27 : i1 to i32
      %c0_i32_18 = arith.constant 0 : i32
      %29 = arith.cmpi ne, %28, %c0_i32_18 : i32
      scf.if %29 {
        %c0_19 = arith.constant 0 : index
        %c0_20 = arith.constant 0 : index
        %30 = vector.load %arg8[%c0_19, %c0_20] : memref<2x128xf32, #tpu.memory_space<vmem>>, vector<1x128xf32>
        %cst_21 = arith.constant 0.001953125 : f32
        %31 = vector.broadcast %cst_21 : f32 to vector<1x128xf32>
        %32 = arith.mulf %30, %31 : vector<1x128xf32>
        %c1_22 = arith.constant 1 : index
        %c0_23 = arith.constant 0 : index
        %33 = vector.load %arg8[%c1_22, %c0_23] : memref<2x128xf32, #tpu.memory_space<vmem>>, vector<1x128xf32>
        %cst_24 = arith.constant 0.001953125 : f32
        %34 = vector.broadcast %cst_24 : f32 to vector<1x128xf32>
        %35 = arith.mulf %33, %34 : vector<1x128xf32>
        %36 = arith.mulf %32, %32 : vector<1x128xf32>
        %37 = arith.subf %35, %36 : vector<1x128xf32>
        %cst_25 = arith.constant 0.000000e+00 : f32
        %38 = vector.broadcast %cst_25 : f32 to vector<1x128xf32>
        %39 = arith.maximumf %37, %38 : vector<1x128xf32>
        %cst_26 = arith.constant 9.99999974E-6 : f32
        %40 = vector.broadcast %cst_26 : f32 to vector<1x128xf32>
        %41 = arith.addf %39, %40 : vector<1x128xf32>
        %42 = math.rsqrt %41 : vector<1x128xf32>
        %c0_27 = arith.constant 0 : index
        %c0_28 = arith.constant 0 : index
        %43 = vector.load %arg4[%c0_27, %c0_28] : memref<1x128xf32, #tpu.memory_space<vmem>>, vector<1x128xf32>
        %44 = arith.mulf %43, %42 : vector<1x128xf32>
        %c0_29 = arith.constant 0 : index
        %c0_30 = arith.constant 0 : index
        %45 = vector.load %arg9[%c0_29, %c0_30] : memref<2x128xf32, #tpu.memory_space<vmem>>, vector<1x128xf32>
        tpu.vector_store %arg9[%c0_29, %c0_30], %44 {strides = array<i32>} : memref<2x128xf32, #tpu.memory_space<vmem>>, vector<1x128xf32>,
        %c0_31 = arith.constant 0 : index
        %c0_32 = arith.constant 0 : index
        %46 = vector.load %arg5[%c0_31, %c0_32] : memref<1x128xf32, #tpu.memory_space<vmem>>, vector<1x128xf32>
        %47 = arith.mulf %32, %44 : vector<1x128xf32>
        %48 = arith.subf %46, %47 : vector<1x128xf32>
        %c1_33 = arith.constant 1 : index
        %c0_34 = arith.constant 0 : index
        %49 = vector.load %arg9[%c1_33, %c0_34] : memref<2x128xf32, #tpu.memory_space<vmem>>, vector<1x128xf32>
        tpu.vector_store %arg9[%c1_33, %c0_34], %48 {strides = array<i32>} : memref<2x128xf32, #tpu.memory_space<vmem>>, vector<1x128xf32>,
      } else {
      }
    } else {
    }
    %c1_i32 = arith.constant 1 : i32
    %3 = arith.cmpi eq, %arg0, %c1_i32 : i32
    %4 = arith.extui %3 : i1 to i32
    %c0_i32_1 = arith.constant 0 : i32
    %5 = arith.cmpi ne, %4, %c0_i32_1 : i32
    scf.if %5 {
      %6 = arith.index_cast %arg1 : i32 to index
      %c0 = arith.constant 0 : index
      %c0_2 = arith.constant 0 : index
      %7 = vector.load %arg7[%6, %c0, %c0_2] : memref<4x128x128xf32, #tpu.memory_space<vmem>>, vector<1x128x128xf32>
      %8 = vector.shape_cast %7 : vector<1x128x128xf32> to vector<128x128xf32>
      %c0_3 = arith.constant 0 : index
      %c0_4 = arith.constant 0 : index
      %9 = vector.load %arg9[%c0_3, %c0_4] : memref<2x128xf32, #tpu.memory_space<vmem>>, vector<1x128xf32>
      %10 = vector.broadcast %9 : vector<1x128xf32> to vector<128x128xf32>
      %11 = arith.mulf %8, %10 : vector<128x128xf32>
      %c1 = arith.constant 1 : index
      %c0_5 = arith.constant 0 : index
      %12 = vector.load %arg9[%c1, %c0_5] : memref<2x128xf32, #tpu.memory_space<vmem>>, vector<1x128xf32>
      %13 = vector.broadcast %12 : vector<1x128xf32> to vector<128x128xf32>
      %14 = arith.addf %11, %13 : vector<128x128xf32>
      %15 = arith.negf %14 : vector<128x128xf32>
      %16 = math.exp %15 : vector<128x128xf32>
      %cst = arith.constant 1.000000e+00 : f32
      %17 = vector.broadcast %cst : f32 to vector<128x128xf32>
      %18 = arith.addf %17, %16 : vector<128x128xf32>
      %19 = arith.divf %17, %18 : vector<128x128xf32>
      %20 = arith.mulf %14, %19 : vector<128x128xf32>
      %c0_6 = arith.constant 0 : index
      %c0_7 = arith.constant 0 : index
      %21 = vector.load %arg6[%c0_6, %c0_7] : memref<128x128xf32, #tpu.memory_space<vmem>>, vector<128x128xf32>
      tpu.vector_store %arg6[%c0_6, %c0_7], %20 {strides = array<i32>} : memref<128x128xf32, #tpu.memory_space<vmem>>, vector<128x128xf32>,
    } else {
    }
    return
  }
  func.func @transform_0(%arg0: i32, %arg1: i32) -> (i32, i32) {
    %c1_i32 = arith.constant 1 : i32
    %0 = arith.subi %c1_i32, %arg0 : i32
    %1 = arith.muli %arg1, %0 : i32
    %c0_i32 = arith.constant 0 : i32
    %c0_i32_0 = arith.constant 0 : i32
    return %1, %c0_i32 : i32, i32
  }
  func.func @transform_1(%arg0: i32, %arg1: i32) -> (i32, i32) {
    %c0_i32 = arith.constant 0 : i32
    %c0_i32_0 = arith.constant 0 : i32
    %c0_i32_1 = arith.constant 0 : i32
    return %c0_i32, %c0_i32_0 : i32, i32
  }
  func.func @transform_2(%arg0: i32, %arg1: i32) -> (i32, i32) {
    %c0_i32 = arith.constant 0 : i32
    %c0_i32_0 = arith.constant 0 : i32
    %c0_i32_1 = arith.constant 0 : i32
    return %c0_i32, %c0_i32_0 : i32, i32
  }
  func.func @transform_3(%arg0: i32, %arg1: i32) -> (i32, i32) {
    %c0_i32 = arith.constant 0 : i32
    %c0_i32_0 = arith.constant 0 : i32
    %c0_i32_1 = arith.constant 0 : i32
    return %c0_i32, %c0_i32_0 : i32, i32
  }
  func.func @transform_4(%arg0: i32, %arg1: i32) -> (i32, i32) {
    %0 = arith.muli %arg1, %arg0 : i32
    %c0_i32 = arith.constant 0 : i32
    %c0_i32_0 = arith.constant 0 : i32
    return %0, %c0_i32 : i32, i32
  }
}

</mosaic_0001>

<bundles_post_ra>
// kernel: conv_forward.1
= control target key start
LH: loop header
LB: loop body
LE: loop exit
PB: predicated region body
PF: predicated region fallthrough
CT: control target
= control target key end

     0   :  { %s1140_s15 = smov 0   ;;  %s1142_s16 = smov 0   ;;  %s1399_s0 = inlined_call_operand.vmem [shape: bf16[512,128], index: 0, kind: input, shape index: {}]   ;;  %s1400_s1 = inlined_call_operand.vmem [shape: bf16[128,128], index: 1, kind: input, shape index: {}]   ;;  %s1401_s2 = inlined_call_operand.vmem [shape: f32[1,128], index: 2, kind: input, shape index: {}]   ;;  %s1402_s3 = inlined_call_operand.vmem [shape: f32[1,128], index: 3, kind: input, shape index: {}]   ;;  %s1403_s4 = inlined_call_operand.vmem [shape: f32[512,128], index: 4, kind: output, shape index: {}]  }
   0x1   :  { %s1144_s17 = smov 0   ;;  %s1146_s18 = smov 0  }
   0x2   :  { %s1148_s19 = smov 0  }
   0x3 LB: > { %s23_s20 = sadd.s32 1, %s1104_s17  ;;  %s26_s21 = sadd.s32 1, %s1108_s18  ;;  %s1112_s19 = sphi %s1148_s19, %s14_s19   ;;  %s1108_s18 = sphi %s1146_s18, %s1407_s18   ;;  %s1104_s17 = sphi %s1144_s17, %s1406_s17   ;;  %s1100_s16 = sphi %s1142_s16, %s1405_s16   ;;  %s1096_s15 = sphi %s1140_s15, %s1404_s15  }
   0x4   : > { %p24_p0 = scmp.ge.s32.totalorder %s23_s20, 4  ;;  %p840_p1 = scmp.ge.s32.totalorder %s1112_s19, 1 }
   0x5   : > { %p185_p2 = scmp.lt.s32.totalorder %s1112_s19, 9 }
   0x6   : > { %s1409_s20 = smov (%p24_p0, %s23_s20), 0  ;;  %s1411_s21 = smov (!%p24_p0, %s26_s21), %s1108_s18 }
   0x7   : > { %p186_p3 = pnand %p840_p1, %p185_p2  ;;  %p28_p4 = scmp.ge.s32.totalorder %s1411_s21, 2 }
   0x8   : > { %s214_s22 = ssub.s32 (!%p186_p3), 1, %s1100_s16  ;;  %s224_s23 = smul.u32 (!%p186_p3), %s1096_s15, %s1100_s16 }
   0x9   : > { %s1413_s21 = smov (%p28_p4, %s1411_s21), 0  ;;  %189 = sbr.rel (%p186_p3) target bundleno = 427 (0x1ab), region = 36 }
   0xa   : > { %s215_s24 = smul.u32 (!%p186_p3), %s1096_s15, %s214_s22  ;;  %s843_s25 = sshll.u32 (!%p186_p3), %s224_s23, 4 }
   0xb   : > { %p226_p5 = scmp.lt.s32.totalorder (!%p186_p3), %s843_s25, 63  ;;  %p845_p7 = scmp.ne.s32.totalorder (!%p186_p3), %s1100_s16, 0 }
   0xc   : > { %s841_s26 = sshll.u32 (!%p186_p3), %s215_s24, 4 }
   0xd   : > { %p217_p6 = scmp.lt.s32.totalorder (!%p186_p3), %s841_s26, 63 }
  0x10   : > { %s1415_s25 = smov (!%p226_p5, %s843_s25), 63  ;;  %s1417_s26 = smov (!%p217_p6, %s841_s26), 63 }
  0x11   : > { %s844_s27 = sshll.u32 %s1415_s25, 3  ;;  %s842_s28 = sshll.u32 %s1417_s26, 2 }
  0x12   : > { %s1181_s5 = scalar_lea.vmem %s1403_s4, %s844_s27  ;;  %s1186_s8 = scalar_lea.vmem %s1399_s0, %s842_s28 }
  0x13   : > { %236 = sbr.rel (%p845_p7) target bundleno = 361 (0x169), region = 40  ;;  %p846_p8 = scmp.ne.s32.totalorder (!%p845_p7), %s1096_s15, 0 }
  0x1a   : > { %240 = sbr.rel (%p846_p8) target bundleno = 33 (0x21), region = 44  ;;  %v1114_v0 = vmov (!%p846_p8), 0.0  }
  0x1b   : > { %241 = vst [vmem:[#allocation3] sm:$0x3] (!%p846_p8), %v1114_v0 }
  0x21 PF: > { %v992_v1 = vld [vmem:[%s1400_s1] sm:$0xff]   ;;  %v993_v2 = vld [vmem:[%s1400_s1 + $0x8] sm:$0xff]   ;;  %v994_v3 = vld [vmem:[%s1400_s1 + $0x10] sm:$0xff]   ;;  %s863_s7 = sshll.u32 %s1096_s15, 7  ;;  %p864_p9 = scmp.ne.s32.totalorder %s1096_s15, 3 }
  0x22   : > { %903 = vmatprep.subr.bf16.mxu0 %v992_v1  ;;  %935 = vmatprep.subr.bf16.mxu1 %v992_v1  ;;  %v995_v4 = vld [vmem:[%s1400_s1 + $0x18] sm:$0xff]   ;;  %v1000_v5 = vld [vmem:[%s1186_s8] sm:$0xff]   ;;  %v997_v8 = vld [vmem:[%s1400_s1 + $0x28] sm:$0xff]   ;;  %s1223_s9 = scalar_lea.vmem [#allocation2], %s863_s7 }
  0x23   : > { %904 = vmatpush3.bf16.msra.mxu0 %v992_v1  ;;  %943 = vmatpush3.bf16.msra.mxu1 %v992_v1  ;;  %v996_v6 = vld [vmem:[%s1400_s1 + $0x20] sm:$0xff]   ;;  %v998_v9 = vld [vmem:[%s1400_s1 + $0x30] sm:$0xff]   ;;  %v999_v10 = vld [vmem:[%s1400_s1 + $0x38] sm:$0xff]  }
  0x24   : > { %905 = vmatprep.subr.bf16.mxu0 %v993_v2  ;;  %936 = vmatprep.subr.bf16.mxu1 %v993_v2  ;;  %v1004_v7 = vld [vmem:[%s1186_s8 + $0x20] sm:$0xff]   ;;  %v1001_v11 = vld [vmem:[%s1186_s8 + $0x8] sm:$0xff]   ;;  %v1002_v13 = vld [vmem:[%s1186_s8 + $0x10] sm:$0xff]  }
  0x25   : > { %919 = vmatprep.mubr.bf16.mxu0 %v1000_v5  ;;  %927 = vmatprep.mubr.bf16.mxu1 %v1004_v7  ;;  %v1005_v12 = vld [vmem:[%s1186_s8 + $0x28] sm:$0xff]   ;;  %v1006_v14 = vld [vmem:[%s1186_s8 + $0x30] sm:$0xff]   ;;  %v1003_v15 = vld [vmem:[%s1186_s8 + $0x18] sm:$0xff]  }
  0x26   : > { %v1007_v16 = vld [vmem:[%s1186_s8 + $0x38] sm:$0xff]  }
  0x27   : > { %906 = vmatpush3.bf16.msra.mxu0 %v993_v2  ;;  %944 = vmatpush3.bf16.msra.mxu1 %v993_v2 }
  0x28   : > { %907 = vmatprep.subr.bf16.mxu0 %v994_v3  ;;  %937 = vmatprep.subr.bf16.mxu1 %v994_v3 }
  0x2b   : > { %908 = vmatpush3.bf16.msra.mxu0 %v994_v3  ;;  %945 = vmatpush3.bf16.msra.mxu1 %v994_v3 }
  0x2c   : > { %909 = vmatprep.subr.bf16.mxu0 %v995_v4  ;;  %938 = vmatprep.subr.bf16.mxu1 %v995_v4 }
  0x2f   : > { %910 = vmatpush3.bf16.msra.mxu0 %v995_v4  ;;  %946 = vmatpush3.bf16.msra.mxu1 %v995_v4 }
  0x30   : > { %911 = vmatprep.subr.bf16.mxu0 %v996_v6  ;;  %939 = vmatprep.subr.bf16.mxu1 %v996_v6 }
  0x33   : > { %912 = vmatpush3.bf16.msra.mxu0 %v996_v6  ;;  %947 = vmatpush3.bf16.msra.mxu1 %v996_v6 }
  0x34   : > { %913 = vmatprep.subr.bf16.mxu0 %v997_v8  ;;  %940 = vmatprep.subr.bf16.mxu1 %v997_v8 }
  0x37   : > { %914 = vmatpush3.bf16.msra.mxu0 %v997_v8  ;;  %948 = vmatpush3.bf16.msra.mxu1 %v997_v8 }
  0x38   : > { %915 = vmatprep.subr.bf16.mxu0 %v998_v9  ;;  %941 = vmatprep.subr.bf16.mxu1 %v998_v9 }
  0x3b   : > { %916 = vmatpush3.bf16.msra.mxu0 %v998_v9  ;;  %949 = vmatpush3.bf16.msra.mxu1 %v998_v9 }
  0x3c   : > { %917 = vmatprep.subr.bf16.mxu0 %v999_v10  ;;  %942 = vmatprep.subr.bf16.mxu1 %v999_v10 }
  0x3f   : > { %918 = vmatpush3.bf16.msra.mxu0 %v999_v10  ;;  %950 = vmatpush3.bf16.msra.mxu1 %v999_v10 }
  0x42   : > { %920 = vmatmul.mubr.bf16.vlgmr.msra.gmra.mrb[0].mxu0 %v1001_v11  ;;  %928 = vmatmul.mubr.bf16.vlgmr.msra.gmra.mrb[0].mxu1 %v1005_v12 }
  0x43   : > { %923 = vmatprep.mubr.bf16.mxu0 %v1002_v13  ;;  %931 = vmatprep.mubr.bf16.mxu1 %v1006_v14 }
  0x4a   : > { %924 = vmatmul.mubr.bf16.gmra.mrb[4].mxu0 %v1003_v15  ;;  %932 = vmatmul.mubr.bf16.gmra.mrb[4].mxu1 %v1007_v16 }
 0x115   : > { %v921_v17 = vpop.f32.mrb[0].mxu0  ;;  %v929_v18 = vpop.f32.mrb[0].mxu1 }
 0x116   : > { %471 = vst [vmem:[%s1223_s9 + $0x10] sm:$0xff] %v921_v17  ;;  %v404_v19 = vpop.f32.mrb[1].mxu0  ;;  %479 = vst [vmem:[%s1223_s9 + $0x50] sm:$0xff] %v929_v18  ;;  %v436_v20 = vpop.f32.mrb[1].mxu1  ;;  %v512_v28 = vmul.f32 %v921_v17, %v921_v17  ;;  %v520_v60 = vmul.f32 %v929_v18, %v929_v18 }
 0x117   : > { %469 = vst [vmem:[%s1223_s9] sm:$0xff] %v404_v19  ;;  %v922_v21 = vpop.f32.mrb[2].mxu0  ;;  %477 = vst [vmem:[%s1223_s9 + $0x40] sm:$0xff] %v436_v20  ;;  %v930_v22 = vpop.f32.mrb[2].mxu1  ;;  %v510_v25 = vmul.f32 %v404_v19, %v404_v19  ;;  %v518_v54 = vmul.f32 %v436_v20, %v436_v20 }
 0x118   : > { %472 = vst [vmem:[%s1223_s9 + $0x18] sm:$0xff] %v922_v21  ;;  %v407_v23 = vpop.f32.mrb[3].mxu0  ;;  %480 = vst [vmem:[%s1223_s9 + $0x58] sm:$0xff] %v930_v22  ;;  %v439_v24 = vpop.f32.mrb[3].mxu1  ;;  %v513_v31 = vmul.f32 %v922_v21, %v922_v21  ;;  %v521_v63 = vmul.f32 %v930_v22, %v930_v22 }
 0x119   : > { %470 = vst [vmem:[%s1223_s9 + $0x8] sm:$0xff] %v407_v23  ;;  %v486_v26 = vadd.f32 %v407_v23, %v404_v19  ;;  %v511_v27 = vmul.f32 %v407_v23, %v407_v23  ;;  %478 = vst [vmem:[%s1223_s9 + $0x48] sm:$0xff] %v439_v24  ;;  %v519_v59 = vmul.f32 %v439_v24, %v439_v24 }
 0x11b   : > { %v487_v29 = vadd.f32 %v921_v17, %v486_v26  ;;  %v526_v30 = vadd.f32 %v511_v27, %v510_v25  ;;  %v509_v27 = vld [vmem:[#allocation3 + $0x1] sm:$0x1] }
 0x11d   : > { %v527_v32 = vadd.f32 %v526_v30, %v512_v28  ;;  %v925_v33 = vpop.f32.mrb[4].mxu0  ;;  %v488_v34 = vadd.f32 %v922_v21, %v487_v29  ;;  %v933_v35 = vpop.f32.mrb[4].mxu1 }
 0x11e   : > { %475 = vst [vmem:[%s1223_s9 + $0x30] sm:$0xff] %v925_v33  ;;  %v420_v36 = vpop.f32.mrb[5].mxu0  ;;  %483 = vst [vmem:[%s1223_s9 + $0x70] sm:$0xff] %v933_v35  ;;  %v452_v37 = vpop.f32.mrb[5].mxu1  ;;  %v516_v48 = vmul.f32 %v925_v33, %v925_v33  ;;  %v524_v8 = vmul.f32 %v933_v35, %v933_v35 }
 0x11f   : > { %473 = vst [vmem:[%s1223_s9 + $0x20] sm:$0xff] %v420_v36  ;;  %v489_v38 = vadd.f32 %v488_v34, %v420_v36  ;;  %v514_v39 = vmul.f32 %v420_v36, %v420_v36  ;;  %v528_v40 = vadd.f32 %v527_v32, %v513_v31  ;;  %v926_v41 = vpop.f32.mrb[6].mxu0  ;;  %481 = vst [vmem:[%s1223_s9 + $0x60] sm:$0xff] %v452_v37  ;;  %v934_v42 = vpop.f32.mrb[6].mxu1 }
 0x120   : > { %476 = vst [vmem:[%s1223_s9 + $0x38] sm:$0xff] %v926_v41  ;;  %v423_v43 = vpop.f32.mrb[7].mxu0  ;;  %484 = vst [vmem:[%s1223_s9 + $0x78] sm:$0xff] %v934_v42  ;;  %v455_v44 = vpop.f32.mrb[7].mxu1  ;;  %v517_v51 = vmul.f32 %v926_v41, %v926_v41  ;;  %v522_v2 = vmul.f32 %v452_v37, %v452_v37  ;;  %v525_v11 = vmul.f32 %v934_v42, %v934_v42 }
 0x121   : > { %v529_v45 = vadd.f32 %v528_v40, %v514_v39  ;;  %474 = vst [vmem:[%s1223_s9 + $0x28] sm:$0xff] %v423_v43  ;;  %v490_v46 = vadd.f32 %v489_v38, %v423_v43  ;;  %v515_v47 = vmul.f32 %v423_v43, %v423_v43  ;;  %482 = vst [vmem:[%s1223_s9 + $0x68] sm:$0xff] %v455_v44  ;;  %v562_v39 = vld [vmem:[%s1401_s2] sm:$0x1] (!%p864_p9) }
 0x122   : > { %v523_v7 = vmul.f32 %v455_v44, %v455_v44 }
 0x123   : > { %v491_v49 = vadd.f32 %v925_v33, %v490_v46  ;;  %v530_v50 = vadd.f32 %v529_v45, %v515_v47 }
 0x125   : > { %v531_v52 = vadd.f32 %v530_v50, %v516_v48  ;;  %v492_v53 = vadd.f32 %v926_v41, %v491_v49 }
 0x127   : > { %v493_v55 = vadd.f32 %v492_v53, %v436_v20  ;;  %v532_v56 = vadd.f32 %v531_v52, %v517_v51 }
 0x129   : > { %v533_v57 = vadd.f32 %v532_v56, %v518_v54  ;;  %v494_v58 = vadd.f32 %v493_v55, %v439_v24  ;;  %v485_v24 = vld [vmem:[#allocation3] sm:$0x1] }
 0x12b   : > { %v495_v61 = vadd.f32 %v929_v18, %v494_v58  ;;  %v534_v62 = vadd.f32 %v533_v57, %v519_v59 }
 0x12d   : > { %v535_v0 = vadd.f32 %v534_v62, %v520_v60  ;;  %v496_v1 = vadd.f32 %v930_v22, %v495_v61 }
 0x12f   : > { %v497_v3 = vadd.f32 %v496_v1, %v452_v37  ;;  %v536_v4 = vadd.f32 %v535_v0, %v521_v63 }
 0x131   : > { %v537_v5 = vadd.f32 %v536_v4, %v522_v2  ;;  %v498_v6 = vadd.f32 %v497_v3, %v455_v44 }
 0x133   : > { %v499_v9 = vadd.f32 %v933_v35, %v498_v6  ;;  %v538_v10 = vadd.f32 %v537_v5, %v523_v7 }
 0x135   : > { %v500_v12 = vadd.f32 %v934_v42, %v499_v9  ;;  %v539_v13 = vadd.f32 %v538_v10, %v524_v8  ;;  %v565_v42 = vld [vmem:[%s1402_s3] sm:$0x1] (!%p864_p9) }
 0x137   : > { %v501_v14 = vrot.slane %v500_v12, 4  ;;  %v540_v15 = vadd.f32 %v539_v13, %v525_v11 }
 0x139   : > { %v502_v16 = vadd.f32 %v501_v14, %v500_v12  ;;  %v541_v17 = vrot.slane %v540_v15, 4 }
 0x13b   : > { %v503_v18 = vrot.slane %v502_v16, 2  ;;  %v542_v19 = vadd.f32 %v541_v17, %v540_v15 }
 0x13d   : > { %v504_v20 = vadd.f32 %v503_v18, %v502_v16  ;;  %v543_v21 = vrot.slane %v542_v19, 2 }
 0x13f   : > { %v505_v22 = vrot.slane %v504_v20, 1  ;;  %v544_v23 = vadd.f32 %v543_v21, %v542_v19 }
 0x141   : > { %v506_v25 = vadd.f32 %v505_v22, %v504_v20  ;;  %v545_v26 = vrot.slane %v544_v23, 1  ;;  %552 = sbr.rel (%p864_p9) target bundleno = 361 (0x169), region = 48 }
 0x143   : > { %v507_v28 = vadd.f32 %v506_v25, %v485_v24  ;;  %v546_v29 = vadd.f32 %v545_v26, %v544_v23 }
 0x145   : > { %508 = vst [vmem:[#allocation3] sm:$0x1] %v507_v28  ;;  %v547_v30 = vadd.f32 %v546_v29, %v509_v27 }
 0x147   : > { %548 = vst [vmem:[#allocation3 + $0x1] sm:$0x1] %v547_v30 }
 0x14c   : > { %v553_v31 = vld [vmem:[#allocation3] sm:$0x1] }
 0x14d   : > { %v554_v33 = vmul.f32 0.001953125, %v553_v31 }
 0x14e   : > { %v555_v32 = vld [vmem:[#allocation3 + $0x1] sm:$0x1] }
 0x14f   : > { %v556_v34 = vmul.f32 0.001953125, %v555_v32  ;;  %v557_v35 = vmul.f32 %v554_v33, %v554_v33 }
 0x151   : > { %v558_v36 = vsub.f32 %v556_v34, %v557_v35 }
 0x153   : > { %v559_v37 = vmax.f32 %v558_v36, 0.0 }
 0x155   : > { %v560_v38 = vadd.f32 1e-05, %v559_v37 }
 0x157   : > { %1008 = vrsqrt.f32 %v560_v38 }
 0x161   : > { %v1009_v40 = vpop.eup %1008 }
 0x162   : > { %v563_v41 = vmul.f32 %v1009_v40, %v562_v39 }
 0x164   : > { %564 = vst [vmem:[#allocation4] sm:$0x1] %v563_v41  ;;  %v566_v43 = vmul.f32 %v563_v41, %v554_v33 }
 0x166   : > { %v567_v44 = vsub.f32 %v565_v42, %v566_v43 }
 0x168   : > { %568 = vst [vmem:[#allocation4 + $0x1] sm:$0x1] %v567_v44 }
 0x169 PF: > { %p865_p10 = scmp.ne.s32.totalorder %s1100_s16, 1 }
 0x16a   : > { %s866_s13 = sshll.u32 (!%p865_p10), %s1096_s15, 7 }
 0x16b   : > { %572 = sbr.rel (%p865_p10) target bundleno = 427 (0x1ab), region = 52  ;;  %v1250_v45 = vld [vmem:[#allocation4] ss:$0 sm:$0xff] (!%p865_p10)  ;;  %s1254_s14 = scalar_lea.vmem (!%p865_p10), [#allocation2], %s866_s13 }
 0x16c   : > { %v575_v47 = vld [vmem:[%s1254_s14] sm:$0xff] (!%p865_p10)  ;;  %v576_v48 = vld [vmem:[%s1254_s14 + $0x8] sm:$0xff] (!%p865_p10)  ;;  %v577_v49 = vld [vmem:[%s1254_s14 + $0x10] sm:$0xff] (!%p865_p10) }
 0x16d   : > { %v596_v50 = vmul.f32 (!%p865_p10), %v1250_v45, %v575_v47  ;;  %v597_v51 = vmul.f32 (!%p865_p10), %v1250_v45, %v576_v48  ;;  %v598_v52 = vmul.f32 (!%p865_p10), %v1250_v45, %v577_v49  ;;  %v578_v53 = vld [vmem:[%s1254_s14 + $0x18] sm:$0xff] (!%p865_p10)  ;;  %v579_v54 = vld [vmem:[%s1254_s14 + $0x20] sm:$0xff] (!%p865_p10)  ;;  %v580_v55 = vld [vmem:[%s1254_s14 + $0x28] sm:$0xff] (!%p865_p10) }
 0x16e   : > { %v599_v56 = vmul.f32 (!%p865_p10), %v1250_v45, %v578_v53  ;;  %v600_v57 = vmul.f32 (!%p865_p10), %v1250_v45, %v579_v54  ;;  %v601_v58 = vmul.f32 (!%p865_p10), %v1250_v45, %v580_v55  ;;  %v581_v59 = vld [vmem:[%s1254_s14 + $0x30] sm:$0xff] (!%p865_p10)  ;;  %v582_v60 = vld [vmem:[%s1254_s14 + $0x38] sm:$0xff] (!%p865_p10)  ;;  %v583_v1 = vld [vmem:[%s1254_s14 + $0x40] sm:$0xff] (!%p865_p10) }
 0x16f   : > { %v1252_v46 = vld [vmem:[#allocation4 + $0x1] ss:$0 sm:$0xff] (!%p865_p10)  ;;  %v602_v0 = vmul.f32 (!%p865_p10), %v1250_v45, %v581_v59  ;;  %v603_v5 = vmul.f32 (!%p865_p10), %v1250_v45, %v582_v60  ;;  %v584_v6 = vld [vmem:[%s1254_s14 + $0x48] sm:$0xff] (!%p865_p10)  ;;  %v585_v7 = vld [vmem:[%s1254_s14 + $0x50] sm:$0xff] (!%p865_p10)  ;;  %v604_v18 = vmul.f32 (!%p865_p10), %v1250_v45, %v583_v1 }
 0x170   : > { %v1271_v61 = vadd.f32 (!%p865_p10), %v1252_v46, %v596_v50  ;;  %v1274_v62 = vadd.f32 (!%p865_p10), %v1252_v46, %v597_v51  ;;  %v1277_v63 = vadd.f32 (!%p865_p10), %v1252_v46, %v598_v52  ;;  %v1282_v2 = vadd.f32 (!%p865_p10), %v1252_v46, %v599_v56  ;;  %v586_v8 = vld [vmem:[%s1254_s14 + $0x58] sm:$0xff] (!%p865_p10)  ;;  %v587_v16 = vld [vmem:[%s1254_s14 + $0x60] sm:$0xff] (!%p865_p10)  ;;  %v588_v38 = vld [vmem:[%s1254_s14 + $0x68] sm:$0xff] (!%p865_p10) }
 0x171   : > { %v1285_v3 = vadd.f32 (!%p865_p10), %v1252_v46, %v600_v57  ;;  %v1288_v4 = vadd.f32 (!%p865_p10), %v1252_v46, %v601_v58  ;;  %v1298_v12 = vadd.f32 (!%p865_p10), %v1252_v46, %v602_v0  ;;  %v1303_v15 = vadd.f32 (!%p865_p10), %v1252_v46, %v603_v5  ;;  %v589_v41 = vld [vmem:[%s1254_s14 + $0x70] sm:$0xff] (!%p865_p10)  ;;  %v590_v44 = vld [vmem:[%s1254_s14 + $0x78] sm:$0xff] (!%p865_p10) }
 0x172   : > { %v869_v9 = vmul.f32 -1.442695, %v1271_v61  ;;  %v870_v10 = vmul.f32 -1.442695, %v1274_v62  ;;  %v871_v11 = vmul.f32 -1.442695, %v1277_v63  ;;  %v605_v19 = vmul.f32 %v1250_v45, %v584_v6 }
 0x173   : > { %v872_v13 = vmul.f32 -1.442695, %v1282_v2  ;;  %v873_v14 = vmul.f32 -1.442695, %v1285_v3  ;;  %v874_v17 = vmul.f32 -1.442695, %v1288_v4  ;;  %v606_v21 = vmul.f32 %v1250_v45, %v585_v7 }
 0x174   : > { %1010 = vpow2.f32 %v869_v9  ;;  %v875_v20 = vmul.f32 -1.442695, %v1298_v12  ;;  %v607_v22 = vmul.f32 %v1250_v45, %v586_v8  ;;  %v1313_v23 = vadd.f32 %v1252_v46, %v604_v18 }
 0x175   : > { %1012 = vpow2.f32 %v870_v10  ;;  %v1316_v24 = vadd.f32 %v1252_v46, %v605_v19  ;;  %v608_v25 = vmul.f32 %v1250_v45, %v587_v16  ;;  %v876_v26 = vmul.f32 -1.442695, %v1303_v15 }
 0x176   : > { %1014 = vpow2.f32 %v871_v11  ;;  %v1321_v27 = vadd.f32 %v1252_v46, %v606_v21  ;;  %v1324_v28 = vadd.f32 %v1252_v46, %v607_v22  ;;  %v877_v29 = vmul.f32 -1.442695, %v1313_v23 }
 0x177   : > { %1016 = vpow2.f32 %v872_v13  ;;  %v1328_v30 = vadd.f32 %v1252_v46, %v608_v25  ;;  %v878_v31 = vmul.f32 -1.442695, %v1316_v24  ;;  %v609_v49 = vmul.f32 %v1250_v45, %v588_v38 }
 0x178   : > { %1018 = vpow2.f32 %v873_v14  ;;  %v879_v32 = vmul.f32 -1.442695, %v1321_v27  ;;  %v880_v33 = vmul.f32 -1.442695, %v1324_v28  ;;  %v610_v52 = vmul.f32 %v1250_v45, %v589_v41 }
 0x179   : > { %1020 = vpow2.f32 %v874_v17  ;;  %v881_v34 = vmul.f32 -1.442695, %v1328_v30  ;;  %v611_v55 = vmul.f32 %v1250_v45, %v590_v44  ;;  %v1341_v60 = vadd.f32 %v1252_v46, %v609_v49 }
 0x17a   : > { %1022 = vpow2.f32 %v875_v20  ;;  %v1344_v5 = vadd.f32 %v1252_v46, %v610_v52 }
 0x17b   : > { %1024 = vpow2.f32 %v876_v26  ;;  %v1347_v45 = vadd.f32 %v1252_v46, %v611_v55  ;;  %v882_v13 = vmul.f32 -1.442695, %v1341_v60 }
 0x17c   : > { %1026 = vpow2.f32 %v877_v29  ;;  %v883_v17 = vmul.f32 -1.442695, %v1344_v5 }
 0x17d   : > { %1028 = vpow2.f32 %v878_v31  ;;  %v884_v19 = vmul.f32 -1.442695, %v1347_v45 }
 0x17e   : > { %v1011_v35 = vpop.eup %1010  ;;  %1030 = vpow2.f32 %v879_v32 }
 0x17f   : > { %v1013_v36 = vpop.eup %1012  ;;  %v681_v37 = vadd.f32 1.0, %v1011_v35  ;;  %1032 = vpow2.f32 %v880_v33 }
 0x180   : > { %v1015_v39 = vpop.eup %1014  ;;  %v682_v40 = vadd.f32 1.0, %v1013_v36  ;;  %1034 = vpow2.f32 %v881_v34 }
 0x181   : > { %v1017_v42 = vpop.eup %1016  ;;  %1036 = vrcp.f32 %v681_v37  ;;  %v683_v43 = vadd.f32 1.0, %v1015_v39 }
 0x182   : > { %v1019_v47 = vpop.eup %1018  ;;  %1038 = vrcp.f32 %v682_v40  ;;  %v684_v48 = vadd.f32 1.0, %v1017_v42 }
 0x183   : > { %v1021_v50 = vpop.eup %1020  ;;  %1040 = vrcp.f32 %v683_v43  ;;  %v685_v51 = vadd.f32 1.0, %v1019_v47 }
 0x184   : > { %v1023_v53 = vpop.eup %1022  ;;  %1042 = vrcp.f32 %v684_v48  ;;  %v686_v54 = vadd.f32 1.0, %v1021_v50 }
 0x185   : > { %v1025_v56 = vpop.eup %1024  ;;  %1044 = vrcp.f32 %v685_v51  ;;  %v687_v57 = vadd.f32 1.0, %v1023_v53 }
 0x186   : > { %v1027_v58 = vpop.eup %1026  ;;  %1046 = vrcp.f32 %v686_v54  ;;  %v688_v59 = vadd.f32 1.0, %v1025_v56 }
 0x187   : > { %v1029_v0 = vpop.eup %1028  ;;  %1048 = vrcp.f32 %v687_v57  ;;  %v689_v1 = vadd.f32 1.0, %v1027_v58 }
 0x188   : > { %v1031_v6 = vpop.eup %1030  ;;  %1050 = vrcp.f32 %v688_v59  ;;  %v690_v7 = vadd.f32 1.0, %v1029_v0 }
 0x189   : > { %v1033_v8 = vpop.eup %1032  ;;  %1052 = vrcp.f32 %v689_v1  ;;  %v691_v9 = vadd.f32 1.0, %v1031_v6 }
 0x18a   : > { %v1035_v10 = vpop.eup %1034  ;;  %1054 = vrcp.f32 %v690_v7  ;;  %v692_v11 = vadd.f32 1.0, %v1033_v8 }
 0x18b   : > { %v1037_v14 = vpop.eup %1036  ;;  %1056 = vrcp.f32 %v691_v9  ;;  %v693_v16 = vadd.f32 1.0, %v1035_v10 }
 0x18c   : > { %v1039_v18 = vpop.eup %1038  ;;  %v729_v46 = vmul.f32 %v1037_v14, %v1271_v61  ;;  %1058 = vrcp.f32 %v692_v11 }
 0x18d   : > { %v1041_v20 = vpop.eup %1040  ;;  %v730_v21 = vmul.f32 %v1039_v18, %v1274_v62  ;;  %1060 = vrcp.f32 %v693_v16 }
 0x18e   : > { %v1043_v22 = vpop.eup %1042  ;;  %745 = vst [vmem:[%s1181_s5] sm:$0xff] %v729_v46  ;;  %v731_v25 = vmul.f32 %v1041_v20, %v1277_v63  ;;  %1062 = vpow2.f32 %v882_v13 }
 0x18f   : > { %v1045_v26 = vpop.eup %1044  ;;  %746 = vst [vmem:[%s1181_s5 + $0x8] sm:$0xff] %v730_v21  ;;  %v732_v29 = vmul.f32 %v1043_v22, %v1282_v2  ;;  %1064 = vpow2.f32 %v883_v17 }
 0x190   : > { %v1047_v61 = vpop.eup %1046  ;;  %747 = vst [vmem:[%s1181_s5 + $0x10] sm:$0xff] %v731_v25  ;;  %v733_v31 = vmul.f32 %v1045_v26, %v1285_v3  ;;  %1066 = vpow2.f32 %v884_v19 }
 0x191   : > { %v1049_v62 = vpop.eup %1048  ;;  %748 = vst [vmem:[%s1181_s5 + $0x18] sm:$0xff] %v732_v29  ;;  %v734_v32 = vmul.f32 %v1047_v61, %v1288_v4 }
 0x192   : > { %v1051_v63 = vpop.eup %1050  ;;  %749 = vst [vmem:[%s1181_s5 + $0x20] sm:$0xff] %v733_v31  ;;  %v735_v33 = vmul.f32 %v1049_v62, %v1298_v12 }
 0x193   : > { %v1053_v34 = vpop.eup %1052  ;;  %750 = vst [vmem:[%s1181_s5 + $0x28] sm:$0xff] %v734_v32  ;;  %v736_v2 = vmul.f32 %v1051_v63, %v1303_v15 }
 0x194   : > { %v1055_v35 = vpop.eup %1054  ;;  %751 = vst [vmem:[%s1181_s5 + $0x30] sm:$0xff] %v735_v33  ;;  %v737_v3 = vmul.f32 %v1053_v34, %v1313_v23 }
 0x195   : > { %v1057_v36 = vpop.eup %1056  ;;  %752 = vst [vmem:[%s1181_s5 + $0x38] sm:$0xff] %v736_v2  ;;  %v738_v4 = vmul.f32 %v1055_v35, %v1316_v24 }
 0x196   : > { %v1059_v37 = vpop.eup %1058  ;;  %753 = vst [vmem:[%s1181_s5 + $0x40] sm:$0xff] %v737_v3  ;;  %v739_v38 = vmul.f32 %v1057_v36, %v1321_v27 }
 0x197   : > { %v1061_v12 = vpop.eup %1060  ;;  %754 = vst [vmem:[%s1181_s5 + $0x48] sm:$0xff] %v738_v4  ;;  %v740_v39 = vmul.f32 %v1059_v37, %v1324_v28 }
 0x198   : > { %v1063_v40 = vpop.eup %1062  ;;  %755 = vst [vmem:[%s1181_s5 + $0x50] sm:$0xff] %v739_v38  ;;  %v741_v15 = vmul.f32 %v1061_v12, %v1328_v30 }
 0x199   : > { %v1065_v41 = vpop.eup %1064  ;;  %756 = vst [vmem:[%s1181_s5 + $0x58] sm:$0xff] %v740_v39  ;;  %v694_v23 = vadd.f32 1.0, %v1063_v40 }
 0x19a   : > { %v1067_v42 = vpop.eup %1066  ;;  %757 = vst [vmem:[%s1181_s5 + $0x60] sm:$0xff] %v741_v15  ;;  %v695_v24 = vadd.f32 1.0, %v1065_v41 }
 0x19b   : > { %1068 = vrcp.f32 %v694_v23  ;;  %v696_v43 = vadd.f32 1.0, %v1067_v42 }
 0x19c   : > { %1070 = vrcp.f32 %v695_v24 }
 0x19d   : > { %1072 = vrcp.f32 %v696_v43 }
 0x1a5   : > { %v1069_v27 = vpop.eup %1068 }
 0x1a6   : > { %v1071_v44 = vpop.eup %1070  ;;  %v742_v28 = vmul.f32 %v1069_v27, %v1341_v60 }
 0x1a7   : > { %v1073_v47 = vpop.eup %1072  ;;  %v743_v30 = vmul.f32 %v1071_v44, %v1344_v5 }
 0x1a8   : > { %758 = vst [vmem:[%s1181_s5 + $0x68] sm:$0xff] %v742_v28  ;;  %v744_v48 = vmul.f32 %v1073_v47, %v1347_v45 }
 0x1a9   : > { %759 = vst [vmem:[%s1181_s5 + $0x70] sm:$0xff] %v743_v30 }
 0x1aa   : > { %760 = vst [vmem:[%s1181_s5 + $0x78] sm:$0xff] %v744_v48 }
 0x1ab PF: > { %s14_s19 = sadd.s32 1, %s1112_s19   ;;  %s1404_s15 = smov %s1104_s17 }
 0x1ac   : > { %p11_p11 = scmp.ge.s32.totalorder %s14_s19, 10   ;;  %s1405_s16 = smov %s1108_s18 }
 0x1ad   : > { %s1406_s17 = smov %s1409_s20  ;;  %s1407_s18 = smov %s1413_s21 }
 0x1ae   :  { %13 = sbr.rel (!%p11_p11) target bundleno = 3 (0x3), region = 84 }

</bundles_post_ra>
